<compile_context>
chip_gen: v7x
topology: tpu7x:2x2x1
jax: 0.10.0
libtpu: 0.0.40
codegen_flags: <defaults>
</compile_context>

<pallas_src>
import jax
import jax.numpy as jnp
from jax.experimental import pallas as pl
from jax.experimental.pallas import tpu as pltpu

_MIB = 1 << 20


def _round_up(x, m):
    return ((x + m - 1) // m) * m


def _tpu_kind():
    try:
        return jax.devices()[0].device_kind.lower()
    except Exception:
        return ""


def _generation_defaults(kind, dim_p):
    """(tm_target, tn_target, scoped-VMEM budget in bytes)."""
    if "7" in kind:                      # v7x: 64 MiB physical VMEM per TC
        tn = 256 if dim_p >= 8192 else 512
        return 512, tn, 56 * _MIB
    if "v6" in kind:                     # v6e: needs ~650 F/B -> big token tile
        return 1024, 512, 100 * _MIB
    if "v5" in kind:                     # v5e: 128 MiB VMEM, slow HBM & MXU
        return 384, 256, 100 * _MIB
    return 512, 512, 56 * _MIB           # unknown: conservative (v7x-safe)


def _working_set_bytes(tm, tn, dim_p, w_bytes, x_bytes, out_bytes):
    return (2 * tm * dim_p * x_bytes            # x tile (double-buffered)
            + 2 * dim_p * (2 * tn) * w_bytes    # fused w1|w3 tile
            + 2 * tn * dim_p * w_bytes          # w2 tile
            + 2 * tm * dim_p * out_bytes        # output tile
            + tm * dim_p * 4)                   # f32 accumulator scratch


def _ffn_kernel(x_ref, w13_ref, w2_ref, o_ref, acc_ref):
    j = pl.program_id(1)

    @pl.when(j == 0)
    def _():
        acc_ref[...] = jnp.zeros_like(acc_ref)

    # First projection: one fused MXU contraction over [dim] for both w1 & w3.
    #   x tile   : [tm, dim_p]   (native dtype, e.g. bf16)
    #   w13 tile : [dim_p, 2*tn] layout per hidden tile j = [w1_tile_j | w3_tile_j]
    h = jnp.dot(x_ref[...], w13_ref[...], preferred_element_type=jnp.float32)
    tn = h.shape[1] // 2
    h1 = h[:, :tn]
    h3 = h[:, tn:]

    # SwiGLU gating in f32 (VPU + EUP); cast down only for the MXU input.
    gated = h1 * jax.nn.sigmoid(h1) * h3

    # Second projection, accumulated in f32 across hidden tiles.
    acc_ref[...] += jnp.dot(gated.astype(w2_ref.dtype), w2_ref[...],
                            preferred_element_type=jnp.float32)

    @pl.when(j == pl.num_programs(1) - 1)
    def _():
        o_ref[...] = acc_ref[...].astype(o_ref.dtype)


def prepare_feed_forward(w1, w2, w3, *, tm=None, tn=None):
    """One-time weight prep (pad + fuse).  Cache the result; do NOT call per step.

    w1: [dim, hidden]   w3: [dim, hidden]   w2: [hidden, dim]
    (torch nn.Linear stores [out, in]; weights here are pre-transposed.)
    """
    dim, hidden = w1.shape
    assert w3.shape == (dim, hidden) and w2.shape == (hidden, dim)

    dim_p = _round_up(dim, 128)
    tm_d, tn_d, budget = _generation_defaults(_tpu_kind(), dim_p)
    if tm is None:
        tm = tm_d
    if tn is None:
        tn = tn_d

    w_bytes = jnp.dtype(w1.dtype).itemsize
    tn = min(tn, _round_up(hidden, 128))
    tn = max(128, (tn // 128) * 128)

    # Shrink tn, then tm, until the double-buffered working set fits the budget.
    def ws(tm_, tn_):
        return _working_set_bytes(tm_, tn_, dim_p, w_bytes, w_bytes, w_bytes)

    while ws(tm, tn) > budget and tn > 128:
        tn = max(128, tn // 2)
    while ws(tm, tn) > budget and tm > 16:
        tm = max(16, tm // 2)

    h_p = _round_up(hidden, tn)
    n_htiles = h_p // tn

    # Zero-pad (exact: silu(0) * 0 == 0; padded w2 rows/cols are zero).
    w1p = jnp.pad(w1, ((0, dim_p - dim), (0, h_p - hidden)))
    w3p = jnp.pad(w3, ((0, dim_p - dim), (0, h_p - hidden)))
    w2p = jnp.pad(w2, ((0, h_p - hidden), (0, dim_p - dim)))

    # Fuse w1/w3 so hidden-tile j is the contiguous slab
    # w13[:, j*2*tn : (j+1)*2*tn] == [w1_tile_j | w3_tile_j].
    w13 = jnp.stack(
        [w1p.reshape(dim_p, n_htiles, tn), w3p.reshape(dim_p, n_htiles, tn)],
        axis=2,
    ).reshape(dim_p, 2 * h_p)

    return dict(w13=w13, w2p=w2p, dim=dim, hidden=hidden, dim_p=dim_p,
                h_p=h_p, tn=tn, tm=tm, vmem_budget=budget)


def feed_forward(x, params):
    """SwiGLU FFN forward.  x: [..., dim]; params from prepare_feed_forward."""
    orig_shape = x.shape
    dim = params["dim"]
    assert orig_shape[-1] == dim
    dim_p, h_p, tn = params["dim_p"], params["h_p"], params["tn"]
    n_htiles = h_p // tn

    x2d = x.reshape(-1, dim)
    n_tok = x2d.shape[0]

    tm = min(params["tm"], _round_up(n_tok, 16))   # 16: bf16 sublane packing
    n_p = _round_up(n_tok, tm)
    xp = jnp.pad(x2d, ((0, n_p - n_tok), (0, dim_p - dim)))

    w13, w2p = params["w13"], params["w2p"]
    w_bytes = jnp.dtype(w13.dtype).itemsize
    x_bytes = jnp.dtype(x.dtype).itemsize

    ws = _working_set_bytes(tm, tn, dim_p, w_bytes, x_bytes, x_bytes)
    vmem_limit = int(min(params["vmem_budget"],
                         max(32 * _MIB, int(ws * 1.2) + 2 * _MIB)))

    cost = pl.CostEstimate(
        flops=6 * n_p * h_p * dim_p,
        transcendentals=n_p * h_p,
        bytes_accessed=(w13.size * w_bytes + w2p.size * w_bytes
                        + xp.size * x_bytes * n_htiles + n_p * dim_p * x_bytes),
    )

    grid = (n_p // tm, n_htiles)

    out = pl.pallas_call(
        _ffn_kernel,
        out_shape=jax.ShapeDtypeStruct((n_p, dim_p), x.dtype),
        grid_spec=pltpu.PrefetchScalarGridSpec(
            num_scalar_prefetch=0,
            grid=grid,
            in_specs=[
                pl.BlockSpec((tm, dim_p), lambda i, j: (i, 0)),      # x row tile
                pl.BlockSpec((dim_p, 2 * tn), lambda i, j: (0, j)),  # fused w1|w3
                pl.BlockSpec((tn, dim_p), lambda i, j: (j, 0)),      # w2 tile
            ],
            out_specs=pl.BlockSpec((tm, dim_p), lambda i, j: (i, 0)),
            scratch_shapes=[pltpu.VMEM((tm, dim_p), jnp.float32)],
        ),
        compiler_params=pltpu.CompilerParams(
            dimension_semantics=("parallel", "arbitrary"),
            vmem_limit_bytes=vmem_limit,
        ),
        cost_estimate=cost,
    )(xp, w13, w2p)

    return out[:n_tok, :dim].reshape(orig_shape)


if __name__ == "__main__":
    # FeedForward(dim=32, hidden_dim=None, multiple_of=32, dropout=0.0)
    dim = 32
    multiple_of = 32
    hidden_dim = 4 * dim
    hidden_dim = int(2 * hidden_dim / 3)
    hidden_dim = multiple_of * ((hidden_dim + multiple_of - 1) // multiple_of)  # 96

    batch, seq = 2, 8

    key = jax.random.PRNGKey(0)
    kx, k1, k2, k3 = jax.random.split(key, 4)

    x = jax.random.normal(kx, (batch, seq, dim), dtype=jnp.float32)
    w1 = jax.random.normal(k1, (dim, hidden_dim), dtype=jnp.float32) / (dim ** 0.5)
    w3 = jax.random.normal(k3, (dim, hidden_dim), dtype=jnp.float32) / (dim ** 0.5)
    w2 = jax.random.normal(k2, (hidden_dim, dim), dtype=jnp.float32) / (hidden_dim ** 0.5)

    # bf16 operands to the MXU (f32 accumulation happens inside the kernel).
    x_bf = x.astype(jnp.bfloat16)
    w1_bf = w1.astype(jnp.bfloat16)
    w2_bf = w2.astype(jnp.bfloat16)
    w3_bf = w3.astype(jnp.bfloat16)

    # One-time weight prep (pad + fuse); reuse across forward calls.
    params = jax.tree_util.tree_map(jax.block_until_ready,
                                    prepare_feed_forward(w1_bf, w2_bf, w3_bf))

    out = feed_forward(x_bf, params)
    out = jax.block_until_ready(out)
    assert out.shape == (batch, seq, dim)
    assert out.dtype == jnp.bfloat16

    # f32 reference on the same (bf16-rounded) values.
    xf = x_bf.astype(jnp.float32).reshape(-1, dim)
    h1 = xf @ w1_bf.astype(jnp.float32)
    h3 = xf @ w3_bf.astype(jnp.float32)
    ref = ((h1 * jax.nn.sigmoid(h1) * h3) @ w2_bf.astype(jnp.float32)).reshape(
        batch, seq, dim)

    err = jnp.max(jnp.abs(out.astype(jnp.float32) - ref))
    assert err < 5e-2, f"mismatch vs reference: max abs err {err}"

    print("KERNEL_OK")
</pallas_src>

<mosaic_0001>
module attributes {stable_mosaic.version = 11 : i64} {
  func.func @_ffn_kernel(%arg0: i32, %arg1: i32, %arg2: memref<16x128xbf16, #tpu.memory_space<vmem>>, %arg3: memref<128x256xbf16, #tpu.memory_space<vmem>>, %arg4: memref<128x128xbf16, #tpu.memory_space<vmem>>, %arg5: memref<16x128xbf16, #tpu.memory_space<vmem>>, %arg6: memref<16x128xf32, #tpu.memory_space<vmem>>) attributes {dimension_semantics = [#tpu.dimension_semantics<parallel>, #tpu.dimension_semantics<arbitrary>], iteration_bounds = array<i64: 1, 1>, scalar_prefetch = 0 : i64, scratch_operands = 1 : i64, tpu.core_type = #tpu.core_type<tc>, window_params = [{transform_indices = @transform_0, window_bounds = array<i64: 16, 128>}, {transform_indices = @transform_1, window_bounds = array<i64: 128, 256>}, {transform_indices = @transform_2, window_bounds = array<i64: 128, 128>}, {transform_indices = @transform_3, window_bounds = array<i64: 16, 128>}]} {
    %c0_i32 = arith.constant 0 : i32
    %0 = arith.cmpi eq, %arg1, %c0_i32 : i32
    %1 = arith.extui %0 : i1 to i32
    %c0_i32_0 = arith.constant 0 : i32
    %2 = arith.cmpi ne, %1, %c0_i32_0 : i32
    scf.if %2 {
      %cst_14 = arith.constant 0.000000e+00 : f32
      %24 = vector.broadcast %cst_14 : f32 to vector<16x128xf32>
      %c0_15 = arith.constant 0 : index
      %c0_16 = arith.constant 0 : index
      %25 = vector.load %arg6[%c0_15, %c0_16] : memref<16x128xf32, #tpu.memory_space<vmem>>, vector<16x128xf32>
      tpu.vector_store %arg6[%c0_15, %c0_16], %24 {strides = array<i32>} : memref<16x128xf32, #tpu.memory_space<vmem>>, vector<16x128xf32>,
    } else {
    }
    %c0 = arith.constant 0 : index
    %c0_1 = arith.constant 0 : index
    %3 = vector.load %arg2[%c0, %c0_1] : memref<16x128xbf16, #tpu.memory_space<vmem>>, vector<16x128xbf16>
    %c0_2 = arith.constant 0 : index
    %c0_3 = arith.constant 0 : index
    %4 = vector.load %arg3[%c0_2, %c0_3] : memref<128x256xbf16, #tpu.memory_space<vmem>>, vector<128x256xbf16>
    %cst = arith.constant dense<0.000000e+00> : vector<16x256xf32>
    %5 = tpu.matmul %3, %4, %cst {dimension_numbers = #tpu.dot_dimension_numbers<[1], [0], [0], [1], [0, 0, 1, 1], [], []>} : vector<16x128xbf16>, vector<128x256xbf16>, vector<16x256xf32> -> vector<16x256xf32>
    %6 = vector.extract_strided_slice %5 {offsets = [0, 0], sizes = [16, 128], strides = [1, 1]} : vector<16x256xf32> to vector<16x128xf32>
    %7 = vector.extract_strided_slice %5 {offsets = [0, 128], sizes = [16, 128], strides = [1, 1]} : vector<16x256xf32> to vector<16x128xf32>
    %8 = arith.negf %6 : vector<16x128xf32>
    %9 = math.exp %8 : vector<16x128xf32>
    %cst_4 = arith.constant 1.000000e+00 : f32
    %10 = vector.broadcast %cst_4 : f32 to vector<16x128xf32>
    %11 = arith.addf %10, %9 : vector<16x128xf32>
    %12 = arith.divf %10, %11 : vector<16x128xf32>
    %13 = arith.mulf %6, %12 : vector<16x128xf32>
    %14 = arith.mulf %13, %7 : vector<16x128xf32>
    %c0_5 = arith.constant 0 : index
    %c0_6 = arith.constant 0 : index
    %15 = vector.load %arg6[%c0_5, %c0_6] : memref<16x128xf32, #tpu.memory_space<vmem>>, vector<16x128xf32>
    %16 = arith.truncf %14 : vector<16x128xf32> to vector<16x128xbf16>
    %c0_7 = arith.constant 0 : index
    %c0_8 = arith.constant 0 : index
    %17 = vector.load %arg4[%c0_7, %c0_8] : memref<128x128xbf16, #tpu.memory_space<vmem>>, vector<128x128xbf16>
    %cst_9 = arith.constant dense<0.000000e+00> : vector<16x128xf32>
    %18 = tpu.matmul %16, %17, %cst_9 {dimension_numbers = #tpu.dot_dimension_numbers<[1], [0], [0], [1], [0, 0, 1, 1], [], []>} : vector<16x128xbf16>, vector<128x128xbf16>, vector<16x128xf32> -> vector<16x128xf32>
    %19 = arith.addf %15, %18 : vector<16x128xf32>
    %c0_10 = arith.constant 0 : index
    %c0_11 = arith.constant 0 : index
    %20 = vector.load %arg6[%c0_10, %c0_11] : memref<16x128xf32, #tpu.memory_space<vmem>>, vector<16x128xf32>
    tpu.vector_store %arg6[%c0_10, %c0_11], %19 {strides = array<i32>} : memref<16x128xf32, #tpu.memory_space<vmem>>, vector<16x128xf32>,
    %c0_i32_12 = arith.constant 0 : i32
    %21 = arith.cmpi eq, %arg1, %c0_i32_12 : i32
    %22 = arith.extui %21 : i1 to i32
    %c0_i32_13 = arith.constant 0 : i32
    %23 = arith.cmpi ne, %22, %c0_i32_13 : i32
    scf.if %23 {
      %c0_14 = arith.constant 0 : index
      %c0_15 = arith.constant 0 : index
      %24 = vector.load %arg6[%c0_14, %c0_15] : memref<16x128xf32, #tpu.memory_space<vmem>>, vector<16x128xf32>
      %25 = arith.truncf %24 : vector<16x128xf32> to vector<16x128xbf16>
      %c0_16 = arith.constant 0 : index
      %c0_17 = arith.constant 0 : index
      %26 = vector.load %arg5[%c0_16, %c0_17] : memref<16x128xbf16, #tpu.memory_space<vmem>>, vector<16x128xbf16>
      tpu.vector_store %arg5[%c0_16, %c0_17], %25 {strides = array<i32>} : memref<16x128xbf16, #tpu.memory_space<vmem>>, vector<16x128xbf16>,
    } else {
    }
    return
  }
  func.func @transform_0(%arg0: i32, %arg1: i32) -> (i32, i32) {
    %c0_i32 = arith.constant 0 : i32
    %c0_i32_0 = arith.constant 0 : i32
    return %arg0, %c0_i32 : i32, i32
  }
  func.func @transform_1(%arg0: i32, %arg1: i32) -> (i32, i32) {
    %c0_i32 = arith.constant 0 : i32
    %c0_i32_0 = arith.constant 0 : i32
    return %c0_i32, %arg1 : i32, i32
  }
  func.func @transform_2(%arg0: i32, %arg1: i32) -> (i32, i32) {
    %c0_i32 = arith.constant 0 : i32
    %c0_i32_0 = arith.constant 0 : i32
    return %arg1, %c0_i32 : i32, i32
  }
  func.func @transform_3(%arg0: i32, %arg1: i32) -> (i32, i32) {
    %c0_i32 = arith.constant 0 : i32
    %c0_i32_0 = arith.constant 0 : i32
    return %arg0, %c0_i32 : i32, i32
  }
}

</mosaic_0001>

<bundles_post_ra>
// kernel: tpu_custom_call.1
= control target key start
LH: loop header
LB: loop body
LE: loop exit
PB: predicated region body
PF: predicated region fallthrough
CT: control target
= control target key end

     0   :  { %8 = vsyncpa [#allocation4], 0  ;;  %s670_s0 = inlined_call_operand.hbm [shape: bf16[16,128], index: 0, kind: input, shape index: {}]   ;;  %s671_s1 = inlined_call_operand.hbm [shape: bf16[128,256], index: 1, kind: input, shape index: {}]   ;;  %s672_s2 = inlined_call_operand.hbm [shape: bf16[128,128], index: 2, kind: input, shape index: {}]   ;;  %s673_s3 = inlined_call_operand.hbm [shape: bf16[16,128], index: 3, kind: output, shape index: {}]  }
   0x1   :  { %9 = vsyncpa [#allocation7], 0 }
   0x2   :  { %10 = vsyncpa [#allocation5], 0  ;;  %s582_s12 = smov [#allocation6]   ;;  %s488_s16 = scalar_lea.hbm %s671_s1, 2048 }
   0x3   :  { %s28_s13 = sshll.u32 %s582_s12, 4  ;;  %p489_p0 = scmp.ne.s32.totalorder %s671_s1, %s488_s16  ;;  %s29_s13 = int_to_ptr.vmem [resolvable:$true] %s28_s13 }
   0x4   :  { %p492_p1 = scmp.lt.u32.totalorder %s488_s16, %s671_s1 }
   0x6   :  { %p494_p2 = pnand %p492_p1, %p489_p0 }
   0x8   :  { %497 = shalt.err (!%p494_p2)
}
   0x9   :  { %s498_s21 = scalar_lea.vmem %s29_s13, 2048  ;;  %p503_p4 = scmp.lt.s32.totalorder %s29_s13, %s29_s13 }
   0xa   :  { %p499_p3 = scmp.ne.s32.totalorder %s29_s13, %s498_s21  ;;  %p504_p5 = scmp.lt.s32.totalorder %s498_s21, %s498_s21 }
   0xc   :  { %p505_p6 = por %p504_p5, %p503_p4 }
   0xe   :  { %p506_p7 = pnand %p505_p6, %p499_p3 }
  0x10   :  { %509 = shalt.err (!%p506_p7)
}
  0x11   :  { %s583_s22 = smov 128   ;;  %s584_s23 = smov 8  }
  0x12   :  { %34 = dma.hbm_to_vmem [thread:$0]  %s671_s1, 2048, %s29_s13, [#allocation7], %s583_s22, %s583_s22, %s584_s23  }
  0x13   :  { %s585_s26 = smov [#allocation3]   ;;  %s510_s30 = scalar_lea.hbm %s670_s0, 128 }
  0x14   :  { %s16_s27 = sshll.u32 %s585_s26, 4  ;;  %p511_p8 = scmp.ne.s32.totalorder %s670_s0, %s510_s30  ;;  %s17_s27 = int_to_ptr.vmem [resolvable:$true] %s16_s27 }
  0x15   :  { %p514_p9 = scmp.lt.u32.totalorder %s510_s30, %s670_s0 }
  0x17   :  { %p516_p10 = pnand %p514_p9, %p511_p8 }
  0x19   :  { %519 = shalt.err (!%p516_p10)
}
  0x1a   :  { %s520_s8 = scalar_lea.vmem %s17_s27, 128  ;;  %p525_p12 = scmp.lt.s32.totalorder %s17_s27, %s17_s27 }
  0x1b   :  { %p521_p11 = scmp.ne.s32.totalorder %s17_s27, %s520_s8  ;;  %p526_p13 = scmp.lt.s32.totalorder %s520_s8, %s520_s8 }
  0x1d   :  { %p527_p0 = por %p526_p13, %p525_p12 }
  0x1f   :  { %p528_p1 = pnand %p527_p0, %p521_p11 }
  0x21   :  { %531 = shalt.err (!%p528_p1)
}
  0x22   :  { %s586_s1 = smov 64   ;;  %s587_s9 = smov 4  }
  0x23   :  { %22 = dma.hbm_to_vmem [thread:$0]  %s670_s0, 128, %s17_s27, [#allocation4], %s586_s1, %s586_s1, %s587_s9  }
  0x24   :  { %s588_s12 = smov [#allocation8]   ;;  %s532_s16 = scalar_lea.hbm %s672_s2, 1024 }
  0x25   :  { %s40_s13 = sshll.u32 %s588_s12, 4  ;;  %p533_p2 = scmp.ne.s32.totalorder %s672_s2, %s532_s16  ;;  %s41_s13 = int_to_ptr.vmem [resolvable:$true] %s40_s13 }
  0x26   :  { %p536_p3 = scmp.lt.u32.totalorder %s532_s16, %s672_s2 }
  0x28   :  { %p538_p4 = pnand %p536_p3, %p533_p2 }
  0x2a   :  { %541 = shalt.err (!%p538_p4)
}
  0x2b   :  { %s542_s21 = scalar_lea.vmem %s41_s13, 1024  ;;  %p547_p6 = scmp.lt.s32.totalorder %s41_s13, %s41_s13 }
  0x2c   :  { %p543_p5 = scmp.ne.s32.totalorder %s41_s13, %s542_s21  ;;  %p548_p7 = scmp.lt.s32.totalorder %s542_s21, %s542_s21 }
  0x2e   :  { %p549_p8 = por %p548_p7, %p547_p6 }
  0x30   :  { %p550_p9 = pnand %p549_p8, %p543_p5 }
  0x32   :  { %553 = shalt.err (!%p550_p9)
}
  0x33   :  { %46 = dma.hbm_to_vmem [thread:$0]  %s672_s2, 1024, %s41_s13, [#allocation7], %s586_s1, %s586_s1, %s587_s9  }
  0x34   :  { %576 = dma.done.wait [#allocation4], 128  }
  0x35   :  { %577 = vsyncadd [#allocation4], 4294967168 }
  0x36   :  { %578 = dma.done.wait [#allocation7], 3072  }
  0x37   :  { %579 = vsyncadd [#allocation7], 4294964224  ;;  %v589_v0 = vmov 0   ;;  %v447_v1 = vld [vmem:[#allocation6 + $0x4] ss:$8 sps:$4 sm:$0xff]   ;;  %v471_v17 = vld [vmem:[#allocation3] sm:$0xff]  }
  0x38   :  { %199 = vmatprep.mubr.bf16.mxu0 %v589_v0  ;;  %v449_v2 = vld [vmem:[#allocation6] ss:$8 sps:$4 sm:$0xff]   ;;  %167 = vmatprep.subr.bf16.mxu0 %v447_v1  ;;  %v450_v3 = vld [vmem:[#allocation6 + $0x14] ss:$8 sps:$4 sm:$0xff]   ;;  %v452_v4 = vld [vmem:[#allocation6 + $0x10] ss:$8 sps:$4 sm:$0xff]  }
  0x39   :  { %168 = vmatpush1.bf16.msra.mxu0 %v449_v2  ;;  %v453_v5 = vld [vmem:[#allocation6 + $0x24] ss:$8 sps:$4 sm:$0xff]   ;;  %v455_v6 = vld [vmem:[#allocation6 + $0x20] ss:$8 sps:$4 sm:$0xff]   ;;  %v456_v7 = vld [vmem:[#allocation6 + $0x34] ss:$8 sps:$4 sm:$0xff]  }
  0x3a   :  { %169 = vmatprep.subr.bf16.mxu0 %v450_v3  ;;  %v458_v8 = vld [vmem:[#allocation6 + $0x30] ss:$8 sps:$4 sm:$0xff]   ;;  %v459_v9 = vld [vmem:[#allocation6 + $0x44] ss:$8 sps:$4 sm:$0xff]   ;;  %v461_v10 = vld [vmem:[#allocation6 + $0x40] ss:$8 sps:$4 sm:$0xff]  }
  0x3b   :  { %v462_v11 = vld [vmem:[#allocation6 + $0x54] ss:$8 sps:$4 sm:$0xff]   ;;  %v464_v12 = vld [vmem:[#allocation6 + $0x50] ss:$8 sps:$4 sm:$0xff]   ;;  %v465_v13 = vld [vmem:[#allocation6 + $0x64] ss:$8 sps:$4 sm:$0xff]  }
  0x3c   :  { %v467_v14 = vld [vmem:[#allocation6 + $0x60] ss:$8 sps:$4 sm:$0xff]   ;;  %v468_v15 = vld [vmem:[#allocation6 + $0x74] ss:$8 sps:$4 sm:$0xff]   ;;  %v470_v16 = vld [vmem:[#allocation6 + $0x70] ss:$8 sps:$4 sm:$0xff]  }
  0x3d   :  { %170 = vmatpush1.bf16.msra.mxu0 %v452_v4  ;;  %v472_v18 = vld [vmem:[#allocation8] sm:$0xff]   ;;  %v590_v19 = vmov 0.0   ;;  %v473_v20 = vld [vmem:[#allocation8 + $0x8] sm:$0xff]   ;;  %v474_v21 = vld [vmem:[#allocation8 + $0x10] sm:$0xff]   ;;  %vm591_vm0 = vmmov 0   ;;  %s592_s2 = smov [#allocation9]  }
  0x3e   :  { %171 = vmatprep.subr.bf16.mxu0 %v453_v5  ;;  %416 = vmatprep.subr.bf16.mxu1 %v590_v19  ;;  %v475_v22 = vld [vmem:[#allocation8 + $0x18] sm:$0xff]   ;;  %v476_v23 = vld [vmem:[#allocation8 + $0x20] sm:$0xff]   ;;  %v477_v24 = vld [vmem:[#allocation8 + $0x28] sm:$0xff]   ;;  %s358_s23 = sshll.u32 %s592_s2, 4  ;;  %s359_s23 = int_to_ptr.vmem [resolvable:$true] %s358_s23 }
  0x3f   :  { %417 = vmatpush3.bf16.msra.mxu1 %v472_v18  ;;  %v478_v25 = vld [vmem:[#allocation8 + $0x30] sm:$0xff]   ;;  %v479_v26 = vld [vmem:[#allocation8 + $0x38] sm:$0xff]   ;;  %432 = vmatprep.mubr.msk.bf16.mxu1 %vm591_vm0, %v590_v19  ;;  %s554_s24 = scalar_lea.vmem %s359_s23, 128  ;;  %p559_p11 = scmp.lt.s32.totalorder %s359_s23, %s359_s23 }
  0x40   :  { %418 = vmatprep.subr.bf16.mxu1 %v590_v19  ;;  %p555_p10 = scmp.ne.s32.totalorder %s359_s23, %s554_s24  ;;  %p560_p12 = scmp.lt.s32.totalorder %s554_s24, %s554_s24 }
  0x41   :  { %172 = vmatpush1.bf16.msra.mxu0 %v455_v6 }
  0x42   :  { %173 = vmatprep.subr.bf16.mxu0 %v456_v7  ;;  %p561_p13 = por %p560_p12, %p559_p11 }
  0x43   :  { %419 = vmatpush3.bf16.msra.mxu1 %v473_v20 }
  0x44   :  { %420 = vmatprep.subr.bf16.mxu1 %v590_v19  ;;  %p562_p0 = pnand %p561_p13, %p555_p10 }
  0x45   :  { %174 = vmatpush1.bf16.msra.mxu0 %v458_v8 }
  0x46   :  { %175 = vmatprep.subr.bf16.mxu0 %v459_v9 }
  0x47   :  { %421 = vmatpush3.bf16.msra.mxu1 %v474_v21 }
  0x48   :  { %422 = vmatprep.subr.bf16.mxu1 %v590_v19 }
  0x49   :  { %176 = vmatpush1.bf16.msra.mxu0 %v461_v10 }
  0x4a   :  { %177 = vmatprep.subr.bf16.mxu0 %v462_v11 }
  0x4b   :  { %423 = vmatpush3.bf16.msra.mxu1 %v475_v22 }
  0x4c   :  { %424 = vmatprep.subr.bf16.mxu1 %v590_v19 }
  0x4d   :  { %178 = vmatpush1.bf16.msra.mxu0 %v464_v12 }
  0x4e   :  { %179 = vmatprep.subr.bf16.mxu0 %v465_v13 }
  0x4f   :  { %425 = vmatpush3.bf16.msra.mxu1 %v476_v23 }
  0x50   :  { %426 = vmatprep.subr.bf16.mxu1 %v590_v19 }
  0x51   :  { %180 = vmatpush1.bf16.msra.mxu0 %v467_v14 }
  0x52   :  { %181 = vmatprep.subr.bf16.mxu0 %v468_v15 }
  0x53   :  { %427 = vmatpush3.bf16.msra.mxu1 %v477_v24 }
  0x54   :  { %428 = vmatprep.subr.bf16.mxu1 %v590_v19 }
  0x55   :  { %182 = vmatpush1.bf16.msra.mxu0 %v470_v16 }
  0x57   :  { %429 = vmatpush3.bf16.msra.mxu1 %v478_v25 }
  0x58   :  { %200 = vmatmul.mubr.bf16.vlgmr.msra.gmra.mrb[0].mxu0 %v471_v17  ;;  %430 = vmatprep.subr.bf16.mxu1 %v590_v19 }
  0x5b   :  { %431 = vmatpush3.bf16.msra.mxu1 %v479_v26 }
 0x12b   :  { %v201_v27 = vpop.f32.mrb[0].mxu0 }
 0x12c   :  { %v388_v28 = vmul.f32 -1.442695, %v201_v27  ;;  %v203_v29 = vpop.f32.mrb[1].mxu0 }
 0x12d   :  { %v205_v30 = vpop.f32.mrb[2].mxu0 }
 0x12e   :  { %480 = vpow2.f32 %v388_v28  ;;  %v389_v31 = vmul.f32 -1.442695, %v205_v30  ;;  %v207_v32 = vpop.f32.mrb[3].mxu0 }
 0x130   :  { %482 = vpow2.f32 %v389_v31 }
 0x138   :  { %v481_v33 = vpop.eup %480 }
 0x139   :  { %v216_v34 = vadd.f32 1.0, %v481_v33 }
 0x13a   :  { %v483_v35 = vpop.eup %482 }
 0x13b   :  { %484 = vrcp.f32 %v216_v34  ;;  %v217_v36 = vadd.f32 1.0, %v483_v35 }
 0x13d   :  { %486 = vrcp.f32 %v217_v36 }
 0x145   :  { %v485_v37 = vpop.eup %484 }
 0x146   :  { %v222_v38 = vmul.f32 %v485_v37, %v201_v27 }
 0x147   :  { %v487_v39 = vpop.eup %486 }
 0x148   :  { %v224_v40 = vmul.f32 %v222_v38, %v203_v29  ;;  %v223_v41 = vmul.f32 %v487_v39, %v205_v30 }
 0x14a   :  { %v225_v42 = vmul.f32 %v223_v41, %v207_v32 }
 0x14c   :  { %v228_v43 = vpack.c.bf16 %v225_v42, %v224_v40 }
 0x14e   :  { %433 = vmatmul.mubr.bf16.vlgmr.msra.gmra.mrb[0].mxu1 %v228_v43 }
 0x221   :  { %v327_v44 = vpop.f32.mrb[0].mxu1 }
 0x222   :  { %v434_v45 = vpop.f32.mrb[1].mxu1 }
 0x223   :  { %v330_v46 = vpop.f32.mrb[2].mxu1 }
 0x224   :  { %v405_v47 = vpack.c.bf16 %v330_v46, %v327_v44  ;;  %v435_v48 = vpop.f32.mrb[3].mxu1 }
 0x226   :  { %406 = vst [vmem:[#allocation9] sm:$0xff] %v405_v47  }
 0x227   :  { %565 = shalt.err (!%p562_p0)
}
 0x228   :  { %s566_s27 = scalar_lea.hbm %s673_s3, 128 }
 0x229   :  { %p567_p1 = scmp.ne.s32.totalorder %s673_s3, %s566_s27  ;;  %p570_p2 = scmp.lt.u32.totalorder %s566_s27, %s673_s3 }
 0x22b   :  { %p572_p3 = pnand %p570_p2, %p567_p1 }
 0x22d   :  { %575 = shalt.err (!%p572_p3)
}
 0x22e   :  { %364 = dma.vmem_to_hbm [thread:$0]  %s359_s23, 128, %s673_s3, [#allocation5], %s586_s1, %s586_s1, %s587_s9  }
 0x22f   :  { %580 = dma.done.wait [#allocation5], 128  }
 0x230   :  { %581 = vsyncadd [#allocation5], 4294967168 }
 0x231   :  { %368 = vsyncpa [#allocation4], 1 }
 0x232   :  { %369 = vsyncpa [#allocation7], 1 }
 0x233   :  { %370 = vsyncpa [#allocation5], 1 }

</bundles_post_ra>
